<compile_context>
chip_gen: v5e
topology: v5e:2x2
jax: 0.10.0
libtpu: 0.0.40
codegen_flags: <defaults>
</compile_context>

<pallas_src>
import functools

import numpy as np

import jax
import jax.numpy as jnp
from jax.experimental import pallas as pl
from jax.experimental.pallas import tpu as pltpu

# -------------------- configuration (small, module-consistent) ---------------
MOTIF_DIM = 32     # motif_dim constructor arg (module default is 639)
ATAC_KN   = 8      # atac_kernel_num
JOINT_KN  = 8      # joint_kernel_num (== joint_dim)
KSIZE     = 3      # conv kernel size; padding='same' -> one zero on each side
PATCH     = 25     # patch_pool = MaxPool1d(25, stride=25)
BN_EPS    = 1e-5


# ----------------------------- in-kernel helpers ------------------------------
def _shift_prev(v):
    """out[l] = v[l-1], out[0] = 0  ('same'-padding left tap). Sublane shift."""
    return jnp.concatenate([jnp.zeros_like(v[0:1]), v[:-1]], axis=0)


def _shift_next(v):
    """out[l] = v[l+1], out[-1] = 0 ('same'-padding right tap). Sublane shift."""
    return jnp.concatenate([v[1:], jnp.zeros_like(v[0:1])], axis=0)


# ------------------------------- Pallas kernel --------------------------------
def _joint_kernel(xp_ref, ap_ref, wa_ref, wxj_ref, waj_ref, bias_ref, wseg_ref,
                  out_ref, mx_ref):
    """Fused per-batch: patch max-pool -> atac conv/BN/relu (VPU) -> joint
    conv/BN/relu (per-tap bf16 matmuls) -> ragged per-peak mean pooling."""
    a_dim = wa_ref.shape[1]
    j_dim = wxj_ref.shape[2]

    # 1) 25-wide / stride-25 max pool as a single reduce over the patch axis
    #    (tree on the VPU/XLU, no 24-deep serial chain, no HBM transpose).
    pooled = jnp.max(xp_ref[0], axis=1)                      # (Lp, M)  f32
    a_pool = jnp.max(ap_ref[0], axis=1, keepdims=True)       # (Lp, 1)  f32

    # 2) atac conv (1 -> A, k=3, 'same') + folded BN + relu: three VPU FMAs on
    #    the pooled raw-atac column -- no im2col, no matmul.
    a_act = jnp.maximum(
        _shift_prev(a_pool) * wa_ref[0:1, :]
        + a_pool * wa_ref[1:2, :]
        + _shift_next(a_pool) * wa_ref[2:3, :]
        + bias_ref[0:1, :a_dim], 0.0)                        # (Lp, A)  f32

    # 3) joint conv (M+A -> J, k=3, 'same') + folded BN + relu: per-tap bf16
    #    matmuls on the unconcatenated x-part (K=M) and A-part (K=A); shift the
    #    small (Lp, J) tap results (exact sublane shifts with boundary zeros).
    pooled_b = pooled.astype(jnp.bfloat16)
    a_act_b = a_act.astype(jnp.bfloat16)
    c_prev = (jnp.dot(pooled_b, wxj_ref[0], preferred_element_type=jnp.float32)
              + jnp.dot(a_act_b, waj_ref[0], preferred_element_type=jnp.float32))
    c_cur = (jnp.dot(pooled_b, wxj_ref[1], preferred_element_type=jnp.float32)
             + jnp.dot(a_act_b, waj_ref[1], preferred_element_type=jnp.float32))
    c_next = (jnp.dot(pooled_b, wxj_ref[2], preferred_element_type=jnp.float32)
              + jnp.dot(a_act_b, waj_ref[2], preferred_element_type=jnp.float32))
    j_act = jnp.maximum(
        _shift_prev(c_prev) + c_cur + _shift_next(c_next)
        + bias_ref[1:2, :j_dim], 0.0)                        # (Lp, J)  f32

    # 4) ragged per-peak mean pooling (+ zero padding for missing peaks) as one
    #    (P, Lp) @ (Lp, J) bf16 matmul; also emit the per-batch max of the
    #    pooled joint output (feeds running_max_joint without a second HBM
    #    reduction pass -- correct because ReLU makes all rows non-negative).
    region = jnp.dot(wseg_ref[0], j_act.astype(jnp.bfloat16),
                     preferred_element_type=jnp.float32)     # (P, J)   f32
    out_ref[0] = region
    mx_ref[0] = jnp.max(region, axis=0, keepdims=True)


def joint_forward(x4, a3, wseg, wa, wxj, waj, bias):
    B, Lp, patch, M = x4.shape
    P = wseg.shape[1]
    J = wxj.shape[2]
    return pl.pallas_call(
        _joint_kernel,
        out_shape=(jax.ShapeDtypeStruct((B, P, J), jnp.float32),
                   jax.ShapeDtypeStruct((B, 1, J), jnp.float32)),
        grid=(B,),
        in_specs=[
            pl.BlockSpec((1, Lp, patch, M), lambda b: (b, 0, 0, 0)),
            pl.BlockSpec((1, Lp, patch), lambda b: (b, 0, 0)),
            pl.BlockSpec(wa.shape, lambda b: (0, 0)),
            pl.BlockSpec(wxj.shape, lambda b: (0, 0, 0)),
            pl.BlockSpec(waj.shape, lambda b: (0, 0, 0)),
            pl.BlockSpec(bias.shape, lambda b: (0, 0)),
            pl.BlockSpec((1, P, Lp), lambda b: (b, 0, 0)),
        ],
        out_specs=(pl.BlockSpec((1, P, J), lambda b: (b, 0, 0)),
                   pl.BlockSpec((1, 1, J), lambda b: (b, 0, 0))),
        # batch samples are independent: megacore-parallel. TODO(synk): for
        # production add an Lp tile axis so each TC gets >= 3-4 pipelined steps.
        compiler_params=pltpu.CompilerParams(dimension_semantics=("parallel",)),
    )(x4, a3, wa, wxj, waj, bias, wseg)


# --------------------------- host-side parameter prep -------------------------
def fold_bn_into_conv(w_atac, w_joint, abn_mean, abn_var, jbn_mean, jbn_var,
                      eps=BN_EPS):
    """Fold eval-mode BatchNorm1d(affine=False) into per-tap conv weights.

    wa   : (K, A)       atac conv taps (VPU path, kept f32).
    wxj  : (K, M, J)    joint conv taps over the motif channels (bf16, MXU).
    waj  : (K, A, J)    joint conv taps over the atac-conv channels (bf16, MXU).
    bias : (2, max(A,J)) row 0 = -mean_a*istd_a, row 1 = -mean_j*istd_j (f32).
    """
    A = w_atac.shape[0]
    J, MA, K = w_joint.shape
    M = MA - A
    istd_a = 1.0 / np.sqrt(abn_var + eps)                 # (A,)
    istd_j = 1.0 / np.sqrt(jbn_var + eps)                 # (J,)

    wa = np.ascontiguousarray((w_atac[:, 0, :] * istd_a[:, None]).T
                              ).astype(np.float32)        # (K, A)
    wj = w_joint * istd_j[:, None, None]                  # (J, M+A, K)
    wxj = np.ascontiguousarray(np.transpose(wj[:, :M, :], (2, 1, 0))
                               ).astype(np.float32)       # (K, M, J)
    waj = np.ascontiguousarray(np.transpose(wj[:, M:, :], (2, 1, 0))
                               ).astype(np.float32)       # (K, A, J)

    bias = np.zeros((2, max(A, J)), np.float32)
    bias[0, :A] = -abn_mean * istd_a
    bias[1, :J] = -jbn_mean * istd_j
    return dict(wa=jnp.asarray(wa),
                wxj=jnp.asarray(wxj, dtype=jnp.bfloat16),
                waj=jnp.asarray(waj, dtype=jnp.bfloat16),
                bias=jnp.asarray(bias))


@functools.lru_cache(maxsize=32)
def _segment_weights_cached(peak_split, n_peaks, max_n_peaks, B, Lp):
    """Dense (B, max_n_peaks, Lp) matrix encoding mean pooling over each peak's
    patch range; the per-sample trailing leftover chunk is dropped, padding
    peaks stay all-zero (== torch's zero padding / empty-chunk behavior).
    NOTE: exact equivalence requires every split length to be a multiple of
    PATCH (same truncation as the module's `i // patch_size`)."""
    patch_split = [s // PATCH for s in peak_split]
    w = np.zeros((B, max_n_peaks, Lp), np.float32)
    idx = 0
    for b in range(B):
        pos = 0
        for p in range(n_peaks[b]):
            ln = patch_split[idx]; idx += 1
            if ln > 0:
                w[b, p, pos:pos + ln] = 1.0 / ln
            pos += ln
        pos += patch_split[idx]; idx += 1    # leftover chunk (dropped by module)
    return jnp.asarray(w, dtype=jnp.bfloat16)


def build_segment_weights(peak_split, n_peaks, max_n_peaks, B, Lp):
    return _segment_weights_cached(tuple(int(s) for s in peak_split),
                                   tuple(int(n) for n in n_peaks),
                                   int(max_n_peaks), int(B), int(Lp))


# -------------------------------- forward pass --------------------------------
def atac_split_pool_max_norm_forward(params, buffers, x, x_region, atac,
                                     peak_split, n_peaks, max_n_peaks,
                                     atac_input_norm=True):
    B, L, M = x.shape
    Lp = L // PATCH

    if atac_input_norm:
        atac = atac / (jnp.max(atac, axis=1, keepdims=True) + 1e-5)

    # running_max buffer update (torch.no_grad), then normalize with the
    # UPDATED buffer -- exactly the module's ordering.
    running_max = jnp.maximum(buffers["running_max"],
                              jnp.max(x_region.reshape(-1, M), axis=0))

    # static ragged peak split -> cached dense segment-mean matrix
    wseg = build_segment_weights(peak_split, n_peaks, max_n_peaks, B, Lp)

    # metadata-only reshapes (row-major splits): NO HBM transpose / concat of
    # the dominant tensor before the kernel.
    x4 = x.reshape(B, Lp, PATCH, M)          # (B, Lp, 25, M)
    a3 = atac.reshape(B, Lp, PATCH)          # (B, Lp, 25)

    joint_region, jmax = joint_forward(x4, a3, wseg, params["wa"],
                                       params["wxj"], params["waj"],
                                       params["bias"])

    running_max_joint = jnp.maximum(buffers["running_max_joint"],
                                    jnp.max(jmax, axis=(0, 1)))

    # tiny max-norm + concat epilogue: plain jnp / XLA (final_bn defaults to
    # False in the module -> not applied).
    out = jnp.concatenate(
        [x_region / (running_max[None, None, :] + 1e-5),
         joint_region / (running_max_joint[None, None, :] + 1e-5)], axis=2)
    new_buffers = dict(running_max=running_max,
                       running_max_joint=running_max_joint)
    return out, new_buffers


# --------------------------- pure-NumPy reference ------------------------------
def _reference_forward(w_atac, w_joint, abn_mean, abn_var, jbn_mean, jbn_var,
                       running_max, running_max_joint, x, x_region, atac,
                       peak_split, n_peaks, max_n_peaks, eps=BN_EPS):
    """NumPy mirror of the PyTorch module (eval-mode BN, mean pooling)."""
    B, L, M = x.shape
    A = w_atac.shape[0]
    J = w_joint.shape[0]
    Lp = L // PATCH

    atac = atac / (atac.max(axis=1, keepdims=True) + 1e-5)
    running_max = np.maximum(running_max, x_region.reshape(-1, M).max(axis=0))
    x_region_n = x_region / (running_max[None, None, :] + 1e-5)

    x_pooled = x.reshape(B, Lp, PATCH, M).max(axis=2)
    a_pooled = atac.reshape(B, Lp, PATCH).max(axis=2)

    a_pad = np.pad(a_pooled, ((0, 0), (1, 1)))
    a_conv = np.zeros((B, Lp, A), np.float32)
    for k in range(KSIZE):
        a_conv += a_pad[:, k:k + Lp, None] * w_atac[None, None, :, 0, k]
    a_act = np.maximum((a_conv - abn_mean) / np.sqrt(abn_var + eps), 0.0)

    y = np.concatenate([x_pooled, a_act], axis=2)
    y_pad = np.pad(y, ((0, 0), (1, 1), (0, 0)))
    j_conv = np.zeros((B, Lp, J), np.float32)
    for k in range(KSIZE):
        j_conv += y_pad[:, k:k + Lp, :] @ w_joint[:, :, k].T
    j_act = np.maximum((j_conv - jbn_mean) / np.sqrt(jbn_var + eps), 0.0)

    flat = j_act.reshape(B * Lp, J)
    patch_split = [s // PATCH for s in peak_split]
    joint_region = np.zeros((B, max_n_peaks, J), np.float32)
    idx = 0
    pos = 0
    for b in range(B):
        for p in range(n_peaks[b]):
            ln = patch_split[idx]; idx += 1
            if ln > 0:
                joint_region[b, p] = flat[pos:pos + ln].mean(axis=0)
            pos += ln
        pos += patch_split[idx]; idx += 1    # leftover chunk (dropped)

    running_max_joint = np.maximum(running_max_joint,
                                   joint_region.reshape(-1, J).max(axis=0))
    joint_region_n = joint_region / (running_max_joint[None, None, :] + 1e-5)
    out = np.concatenate([x_region_n, joint_region_n], axis=2)
    return out, running_max, running_max_joint


# ------------------------------------ main -------------------------------------
if __name__ == "__main__":
    key = jax.random.PRNGKey(0)
    kx, kxr, ka, kw1, kw2 = jax.random.split(key, 5)

    B = 2
    max_n_peaks = 4
    n_peaks = (3, 2)
    Lp = 16
    L = Lp * PATCH                       # 400
    # per sample: n_peaks peak chunks + 1 leftover chunk (bp, multiples of 25),
    # summing to L = 400 bp for each sample.
    peak_split = (100, 125, 75, 100,     # sample 0: peaks of 4, 5, 3 patches + 4 leftover
                  150, 100, 150)         # sample 1: peaks of 6, 4 patches + 6 leftover

    x = jax.random.uniform(kx, (B, L, MOTIF_DIM), jnp.float32)
    x_region = jax.random.uniform(kxr, (B, max_n_peaks, MOTIF_DIM), jnp.float32)
    atac = jax.random.uniform(ka, (B, L), jnp.float32)

    # module parameters (torch Conv1d layouts) + fresh eval-mode BN stats
    w_atac = np.asarray(jax.random.normal(kw1, (ATAC_KN, 1, KSIZE), jnp.float32)) * 0.1
    w_joint = np.asarray(jax.random.normal(
        kw2, (JOINT_KN, MOTIF_DIM + ATAC_KN, KSIZE), jnp.float32)) * 0.1
    abn_mean = np.zeros(ATAC_KN, np.float32)
    abn_var = np.ones(ATAC_KN, np.float32)
    jbn_mean = np.zeros(JOINT_KN, np.float32)
    jbn_var = np.ones(JOINT_KN, np.float32)

    params = fold_bn_into_conv(w_atac, w_joint, abn_mean, abn_var,
                               jbn_mean, jbn_var)
    buffers = dict(running_max=jnp.ones((MOTIF_DIM,), jnp.float32),
                   running_max_joint=jnp.ones((JOINT_KN,), jnp.float32))

    out, new_buffers = atac_split_pool_max_norm_forward(
        params, buffers, x, x_region, atac, peak_split, n_peaks, max_n_peaks)
    out = jax.block_until_ready(out)
    assert out.shape == (B, max_n_peaks, MOTIF_DIM + JOINT_KN)
    assert out.dtype == jnp.float32

    # numerical check against a pure-NumPy mirror of the PyTorch module
    # (tolerance covers the bf16 MXU operands inside the kernel).
    ref_out, ref_rm, ref_rmj = _reference_forward(
        w_atac.astype(np.float32), w_joint.astype(np.float32),
        abn_mean, abn_var, jbn_mean, jbn_var,
        np.ones(MOTIF_DIM, np.float32), np.ones(JOINT_KN, np.float32),
        np.asarray(x), np.asarray(x_region), np.asarray(atac),
        peak_split, n_peaks, max_n_peaks)
    np.testing.assert_allclose(np.asarray(out), ref_out, rtol=3e-2, atol=3e-2)
    np.testing.assert_allclose(np.asarray(new_buffers["running_max"]), ref_rm,
                               rtol=1e-5, atol=1e-5)
    np.testing.assert_allclose(np.asarray(new_buffers["running_max_joint"]),
                               ref_rmj, rtol=3e-2, atol=3e-2)
    print("KERNEL_OK")
</pallas_src>

<mosaic_0001>
module attributes {stable_mosaic.version = 11 : i64} {
  func.func @_joint_kernel(%arg0: i32, %arg1: memref<1x16x25x32xf32, #tpu.memory_space<vmem>>, %arg2: memref<1x16x25xf32, #tpu.memory_space<vmem>>, %arg3: memref<3x8xf32, #tpu.memory_space<vmem>>, %arg4: memref<3x32x8xbf16, #tpu.memory_space<vmem>>, %arg5: memref<3x8x8xbf16, #tpu.memory_space<vmem>>, %arg6: memref<2x8xf32, #tpu.memory_space<vmem>>, %arg7: memref<1x4x16xbf16, #tpu.memory_space<vmem>>, %arg8: memref<1x4x8xf32, #tpu.memory_space<vmem>>, %arg9: memref<1x1x8xf32, #tpu.memory_space<vmem>>) attributes {dimension_semantics = [#tpu.dimension_semantics<parallel>], iteration_bounds = array<i64: 2>, scalar_prefetch = 0 : i64, scratch_operands = 0 : i64, tpu.core_type = #tpu.core_type<tc>, window_params = [{transform_indices = @transform_0, window_bounds = array<i64: 1, 16, 25, 32>}, {transform_indices = @transform_1, window_bounds = array<i64: 1, 16, 25>}, {pipeline_mode = #tpu.pipeline_mode<synchronous>, transform_indices = @transform_2, window_bounds = array<i64: 3, 8>}, {pipeline_mode = #tpu.pipeline_mode<synchronous>, transform_indices = @transform_3, window_bounds = array<i64: 3, 32, 8>}, {pipeline_mode = #tpu.pipeline_mode<synchronous>, transform_indices = @transform_4, window_bounds = array<i64: 3, 8, 8>}, {pipeline_mode = #tpu.pipeline_mode<synchronous>, transform_indices = @transform_5, window_bounds = array<i64: 2, 8>}, {transform_indices = @transform_6, window_bounds = array<i64: 1, 4, 16>}, {transform_indices = @transform_7, window_bounds = array<i64: 1, 4, 8>}, {transform_indices = @transform_8, window_bounds = array<i64: 1, 1, 8>}]} {
    %c0 = arith.constant 0 : index
    %c0_0 = arith.constant 0 : index
    %c0_1 = arith.constant 0 : index
    %c0_2 = arith.constant 0 : index
    %0 = vector.load %arg1[%c0, %c0_0, %c0_1, %c0_2] : memref<1x16x25x32xf32, #tpu.memory_space<vmem>>, vector<1x16x25x32xf32>
    %1 = vector.shape_cast %0 : vector<1x16x25x32xf32> to vector<16x25x32xf32>
    %cst = arith.constant dense<0xFF800000> : vector<16x32xf32>
    %2 = vector.multi_reduction <maximumf>, %1, %cst [1] : vector<16x25x32xf32> to vector<16x32xf32>
    %c0_3 = arith.constant 0 : index
    %c0_4 = arith.constant 0 : index
    %c0_5 = arith.constant 0 : index
    %3 = vector.load %arg2[%c0_3, %c0_4, %c0_5] : memref<1x16x25xf32, #tpu.memory_space<vmem>>, vector<1x16x25xf32>
    %4 = vector.shape_cast %3 : vector<1x16x25xf32> to vector<16x25xf32>
    %cst_6 = arith.constant dense<0xFF800000> : vector<16xf32>
    %5 = vector.multi_reduction <maximumf>, %4, %cst_6 [1] : vector<16x25xf32> to vector<16xf32>
    %6 = vector.shape_cast %5 : vector<16xf32> to vector<16x1xf32>
    %cst_7 = arith.constant 0.000000e+00 : f32
    %7 = vector.broadcast %cst_7 : f32 to vector<1x1xf32>
    %8 = vector.extract_strided_slice %6 {offsets = [0, 0], sizes = [15, 1], strides = [1, 1]} : vector<16x1xf32> to vector<15x1xf32>
    %9 = tpu.concatenate %7, %8 in 0 : vector<1x1xf32>, vector<15x1xf32> -> vector<16x1xf32>
    %c0_8 = arith.constant 0 : index
    %c0_9 = arith.constant 0 : index
    %10 = vector.load %arg3[%c0_8, %c0_9] : memref<3x8xf32, #tpu.memory_space<vmem>>, vector<1x8xf32>
    %11 = vector.broadcast %9 : vector<16x1xf32> to vector<16x8xf32>
    %12 = vector.broadcast %10 : vector<1x8xf32> to vector<16x8xf32>
    %13 = arith.mulf %11, %12 : vector<16x8xf32>
    %c1 = arith.constant 1 : index
    %c0_10 = arith.constant 0 : index
    %14 = vector.load %arg3[%c1, %c0_10] : memref<3x8xf32, #tpu.memory_space<vmem>>, vector<1x8xf32>
    %15 = vector.broadcast %6 : vector<16x1xf32> to vector<16x8xf32>
    %16 = vector.broadcast %14 : vector<1x8xf32> to vector<16x8xf32>
    %17 = arith.mulf %15, %16 : vector<16x8xf32>
    %18 = arith.addf %13, %17 : vector<16x8xf32>
    %19 = vector.extract_strided_slice %6 {offsets = [1, 0], sizes = [15, 1], strides = [1, 1]} : vector<16x1xf32> to vector<15x1xf32>
    %cst_11 = arith.constant 0.000000e+00 : f32
    %20 = vector.broadcast %cst_11 : f32 to vector<1x1xf32>
    %21 = tpu.concatenate %19, %20 in 0 : vector<15x1xf32>, vector<1x1xf32> -> vector<16x1xf32>
    %c2 = arith.constant 2 : index
    %c0_12 = arith.constant 0 : index
    %22 = vector.load %arg3[%c2, %c0_12] : memref<3x8xf32, #tpu.memory_space<vmem>>, vector<1x8xf32>
    %23 = vector.broadcast %21 : vector<16x1xf32> to vector<16x8xf32>
    %24 = vector.broadcast %22 : vector<1x8xf32> to vector<16x8xf32>
    %25 = arith.mulf %23, %24 : vector<16x8xf32>
    %26 = arith.addf %18, %25 : vector<16x8xf32>
    %c0_13 = arith.constant 0 : index
    %c0_14 = arith.constant 0 : index
    %27 = vector.load %arg6[%c0_13, %c0_14] : memref<2x8xf32, #tpu.memory_space<vmem>>, vector<1x8xf32>
    %28 = vector.broadcast %27 : vector<1x8xf32> to vector<16x8xf32>
    %29 = arith.addf %26, %28 : vector<16x8xf32>
    %cst_15 = arith.constant 0.000000e+00 : f32
    %30 = vector.broadcast %cst_15 : f32 to vector<16x8xf32>
    %31 = arith.maximumf %29, %30 : vector<16x8xf32>
    %32 = arith.truncf %2 : vector<16x32xf32> to vector<16x32xbf16>
    %33 = arith.truncf %31 : vector<16x8xf32> to vector<16x8xbf16>
    %c0_16 = arith.constant 0 : index
    %c0_17 = arith.constant 0 : index
    %c0_18 = arith.constant 0 : index
    %34 = vector.load %arg4[%c0_16, %c0_17, %c0_18] : memref<3x32x8xbf16, #tpu.memory_space<vmem>>, vector<1x32x8xbf16>
    %35 = vector.shape_cast %34 : vector<1x32x8xbf16> to vector<32x8xbf16>
    %cst_19 = arith.constant dense<0.000000e+00> : vector<16x8xf32>
    %36 = tpu.matmul %32, %35, %cst_19 {dimension_numbers = #tpu.dot_dimension_numbers<[1], [0], [0], [1], [0, 0, 1, 1], [], []>} : vector<16x32xbf16>, vector<32x8xbf16>, vector<16x8xf32> -> vector<16x8xf32>
    %c0_20 = arith.constant 0 : index
    %c0_21 = arith.constant 0 : index
    %c0_22 = arith.constant 0 : index
    %37 = vector.load %arg5[%c0_20, %c0_21, %c0_22] : memref<3x8x8xbf16, #tpu.memory_space<vmem>>, vector<1x8x8xbf16>
    %38 = vector.shape_cast %37 : vector<1x8x8xbf16> to vector<8x8xbf16>
    %cst_23 = arith.constant dense<0.000000e+00> : vector<16x8xf32>
    %39 = tpu.matmul %33, %38, %cst_23 {dimension_numbers = #tpu.dot_dimension_numbers<[1], [0], [0], [1], [0, 0, 1, 1], [], []>} : vector<16x8xbf16>, vector<8x8xbf16>, vector<16x8xf32> -> vector<16x8xf32>
    %40 = arith.addf %36, %39 : vector<16x8xf32>
    %c1_24 = arith.constant 1 : index
    %c0_25 = arith.constant 0 : index
    %c0_26 = arith.constant 0 : index
    %41 = vector.load %arg4[%c1_24, %c0_25, %c0_26] : memref<3x32x8xbf16, #tpu.memory_space<vmem>>, vector<1x32x8xbf16>
    %42 = vector.shape_cast %41 : vector<1x32x8xbf16> to vector<32x8xbf16>
    %cst_27 = arith.constant dense<0.000000e+00> : vector<16x8xf32>
    %43 = tpu.matmul %32, %42, %cst_27 {dimension_numbers = #tpu.dot_dimension_numbers<[1], [0], [0], [1], [0, 0, 1, 1], [], []>} : vector<16x32xbf16>, vector<32x8xbf16>, vector<16x8xf32> -> vector<16x8xf32>
    %c1_28 = arith.constant 1 : index
    %c0_29 = arith.constant 0 : index
    %c0_30 = arith.constant 0 : index
    %44 = vector.load %arg5[%c1_28, %c0_29, %c0_30] : memref<3x8x8xbf16, #tpu.memory_space<vmem>>, vector<1x8x8xbf16>
    %45 = vector.shape_cast %44 : vector<1x8x8xbf16> to vector<8x8xbf16>
    %cst_31 = arith.constant dense<0.000000e+00> : vector<16x8xf32>
    %46 = tpu.matmul %33, %45, %cst_31 {dimension_numbers = #tpu.dot_dimension_numbers<[1], [0], [0], [1], [0, 0, 1, 1], [], []>} : vector<16x8xbf16>, vector<8x8xbf16>, vector<16x8xf32> -> vector<16x8xf32>
    %47 = arith.addf %43, %46 : vector<16x8xf32>
    %c2_32 = arith.constant 2 : index
    %c0_33 = arith.constant 0 : index
    %c0_34 = arith.constant 0 : index
    %48 = vector.load %arg4[%c2_32, %c0_33, %c0_34] : memref<3x32x8xbf16, #tpu.memory_space<vmem>>, vector<1x32x8xbf16>
    %49 = vector.shape_cast %48 : vector<1x32x8xbf16> to vector<32x8xbf16>
    %cst_35 = arith.constant dense<0.000000e+00> : vector<16x8xf32>
    %50 = tpu.matmul %32, %49, %cst_35 {dimension_numbers = #tpu.dot_dimension_numbers<[1], [0], [0], [1], [0, 0, 1, 1], [], []>} : vector<16x32xbf16>, vector<32x8xbf16>, vector<16x8xf32> -> vector<16x8xf32>
    %c2_36 = arith.constant 2 : index
    %c0_37 = arith.constant 0 : index
    %c0_38 = arith.constant 0 : index
    %51 = vector.load %arg5[%c2_36, %c0_37, %c0_38] : memref<3x8x8xbf16, #tpu.memory_space<vmem>>, vector<1x8x8xbf16>
    %52 = vector.shape_cast %51 : vector<1x8x8xbf16> to vector<8x8xbf16>
    %cst_39 = arith.constant dense<0.000000e+00> : vector<16x8xf32>
    %53 = tpu.matmul %33, %52, %cst_39 {dimension_numbers = #tpu.dot_dimension_numbers<[1], [0], [0], [1], [0, 0, 1, 1], [], []>} : vector<16x8xbf16>, vector<8x8xbf16>, vector<16x8xf32> -> vector<16x8xf32>
    %54 = arith.addf %50, %53 : vector<16x8xf32>
    %cst_40 = arith.constant 0.000000e+00 : f32
    %55 = vector.broadcast %cst_40 : f32 to vector<1x8xf32>
    %56 = vector.extract_strided_slice %40 {offsets = [0, 0], sizes = [15, 8], strides = [1, 1]} : vector<16x8xf32> to vector<15x8xf32>
    %57 = tpu.concatenate %55, %56 in 0 : vector<1x8xf32>, vector<15x8xf32> -> vector<16x8xf32>
    %58 = arith.addf %57, %47 : vector<16x8xf32>
    %59 = vector.extract_strided_slice %54 {offsets = [1, 0], sizes = [15, 8], strides = [1, 1]} : vector<16x8xf32> to vector<15x8xf32>
    %cst_41 = arith.constant 0.000000e+00 : f32
    %60 = vector.broadcast %cst_41 : f32 to vector<1x8xf32>
    %61 = tpu.concatenate %59, %60 in 0 : vector<15x8xf32>, vector<1x8xf32> -> vector<16x8xf32>
    %62 = arith.addf %58, %61 : vector<16x8xf32>
    %c1_42 = arith.constant 1 : index
    %c0_43 = arith.constant 0 : index
    %63 = vector.load %arg6[%c1_42, %c0_43] : memref<2x8xf32, #tpu.memory_space<vmem>>, vector<1x8xf32>
    %64 = vector.broadcast %63 : vector<1x8xf32> to vector<16x8xf32>
    %65 = arith.addf %62, %64 : vector<16x8xf32>
    %cst_44 = arith.constant 0.000000e+00 : f32
    %66 = vector.broadcast %cst_44 : f32 to vector<16x8xf32>
    %67 = arith.maximumf %65, %66 : vector<16x8xf32>
    %c0_45 = arith.constant 0 : index
    %c0_46 = arith.constant 0 : index
    %c0_47 = arith.constant 0 : index
    %68 = vector.load %arg7[%c0_45, %c0_46, %c0_47] : memref<1x4x16xbf16, #tpu.memory_space<vmem>>, vector<1x4x16xbf16>
    %69 = vector.shape_cast %68 : vector<1x4x16xbf16> to vector<4x16xbf16>
    %70 = arith.truncf %67 : vector<16x8xf32> to vector<16x8xbf16>
    %cst_48 = arith.constant dense<0.000000e+00> : vector<4x8xf32>
    %71 = tpu.matmul %69, %70, %cst_48 {dimension_numbers = #tpu.dot_dimension_numbers<[1], [0], [0], [1], [0, 0, 1, 1], [], []>} : vector<4x16xbf16>, vector<16x8xbf16>, vector<4x8xf32> -> vector<4x8xf32>
    %c0_49 = arith.constant 0 : index
    %c0_50 = arith.constant 0 : index
    %c0_51 = arith.constant 0 : index
    %72 = vector.load %arg8[%c0_49, %c0_50, %c0_51] : memref<1x4x8xf32, #tpu.memory_space<vmem>>, vector<1x4x8xf32>
    %73 = vector.shape_cast %72 : vector<1x4x8xf32> to vector<4x8xf32>
    %74 = vector.shape_cast %71 : vector<4x8xf32> to vector<1x4x8xf32>
    tpu.vector_store %arg8[%c0_49, %c0_50, %c0_51], %74 {strides = array<i32>} : memref<1x4x8xf32, #tpu.memory_space<vmem>>, vector<1x4x8xf32>,
    %cst_52 = arith.constant dense<0xFF800000> : vector<8xf32>
    %75 = vector.multi_reduction <maximumf>, %71, %cst_52 [0] : vector<4x8xf32> to vector<8xf32>
    %76 = vector.shape_cast %75 : vector<8xf32> to vector<1x8xf32>
    %c0_53 = arith.constant 0 : index
    %c0_54 = arith.constant 0 : index
    %c0_55 = arith.constant 0 : index
    %77 = vector.load %arg9[%c0_53, %c0_54, %c0_55] : memref<1x1x8xf32, #tpu.memory_space<vmem>>, vector<1x1x8xf32>
    %78 = vector.shape_cast %77 : vector<1x1x8xf32> to vector<1x8xf32>
    %79 = vector.shape_cast %76 : vector<1x8xf32> to vector<1x1x8xf32>
    tpu.vector_store %arg9[%c0_53, %c0_54, %c0_55], %79 {strides = array<i32>} : memref<1x1x8xf32, #tpu.memory_space<vmem>>, vector<1x1x8xf32>,
    return
  }
  func.func @transform_0(%arg0: i32) -> (i32, i32, i32, i32) {
    %c0_i32 = arith.constant 0 : i32
    %c0_i32_0 = arith.constant 0 : i32
    %c0_i32_1 = arith.constant 0 : i32
    %c0_i32_2 = arith.constant 0 : i32
    return %arg0, %c0_i32, %c0_i32_0, %c0_i32_1 : i32, i32, i32, i32
  }
  func.func @transform_1(%arg0: i32) -> (i32, i32, i32) {
    %c0_i32 = arith.constant 0 : i32
    %c0_i32_0 = arith.constant 0 : i32
    %c0_i32_1 = arith.constant 0 : i32
    return %arg0, %c0_i32, %c0_i32_0 : i32, i32, i32
  }
  func.func @transform_2(%arg0: i32) -> (i32, i32) {
    %c0_i32 = arith.constant 0 : i32
    %c0_i32_0 = arith.constant 0 : i32
    %c0_i32_1 = arith.constant 0 : i32
    return %c0_i32, %c0_i32_0 : i32, i32
  }
  func.func @transform_3(%arg0: i32) -> (i32, i32, i32) {
    %c0_i32 = arith.constant 0 : i32
    %c0_i32_0 = arith.constant 0 : i32
    %c0_i32_1 = arith.constant 0 : i32
    %c0_i32_2 = arith.constant 0 : i32
    return %c0_i32, %c0_i32_0, %c0_i32_1 : i32, i32, i32
  }
  func.func @transform_4(%arg0: i32) -> (i32, i32, i32) {
    %c0_i32 = arith.constant 0 : i32
    %c0_i32_0 = arith.constant 0 : i32
    %c0_i32_1 = arith.constant 0 : i32
    %c0_i32_2 = arith.constant 0 : i32
    return %c0_i32, %c0_i32_0, %c0_i32_1 : i32, i32, i32
  }
  func.func @transform_5(%arg0: i32) -> (i32, i32) {
    %c0_i32 = arith.constant 0 : i32
    %c0_i32_0 = arith.constant 0 : i32
    %c0_i32_1 = arith.constant 0 : i32
    return %c0_i32, %c0_i32_0 : i32, i32
  }
  func.func @transform_6(%arg0: i32) -> (i32, i32, i32) {
    %c0_i32 = arith.constant 0 : i32
    %c0_i32_0 = arith.constant 0 : i32
    %c0_i32_1 = arith.constant 0 : i32
    return %arg0, %c0_i32, %c0_i32_0 : i32, i32, i32
  }
  func.func @transform_7(%arg0: i32) -> (i32, i32, i32) {
    %c0_i32 = arith.constant 0 : i32
    %c0_i32_0 = arith.constant 0 : i32
    %c0_i32_1 = arith.constant 0 : i32
    return %arg0, %c0_i32, %c0_i32_0 : i32, i32, i32
  }
  func.func @transform_8(%arg0: i32) -> (i32, i32, i32) {
    %c0_i32 = arith.constant 0 : i32
    %c0_i32_0 = arith.constant 0 : i32
    %c0_i32_1 = arith.constant 0 : i32
    return %arg0, %c0_i32, %c0_i32_0 : i32, i32, i32
  }
}

</mosaic_0001>

<bundles_post_ra>
// kernel: tpu_custom_call.1
= control target key start
LH: loop header
LB: loop body
LE: loop exit
PB: predicated region body
PF: predicated region fallthrough
CT: control target
= control target key end

     0   :  { %14 = vsyncpa [#allocation3], 0  ;;  %s1753_s0 = inlined_call_operand.vmem [shape: f32[2,16,25,32], index: 0, kind: input, shape index: {}]   ;;  %s1754_s1 = inlined_call_operand.vmem [shape: f32[2,16,25], index: 1, kind: input, shape index: {}]   ;;  %s1755_s2 = inlined_call_operand.vmem [shape: f32[3,8], index: 2, kind: input, shape index: {}]   ;;  %s1756_s3 = inlined_call_operand.vmem [shape: bf16[3,32,8], index: 3, kind: input, shape index: {}]   ;;  %s1757_s4 = inlined_call_operand.vmem [shape: bf16[3,8,8], index: 4, kind: input, shape index: {}]   ;;  %s1758_s5 = inlined_call_operand.vmem [shape: f32[2,8], index: 5, kind: input, shape index: {}]   ;;  %s1759_s6 = inlined_call_operand.vmem [shape: bf16[2,4,16], index: 6, kind: input, shape index: {}]   ;;  %s1760_s7 = inlined_call_operand.hbm [shape: f32[2,4,8], index: 7, kind: output, shape index: {0}]   ;;  %s1761_s8 = inlined_call_operand.hbm [shape: f32[2,1,8], index: 8, kind: output, shape index: {1}]  }
   0x1   :  { %16 = vsyncpa [#allocation3 + $0x1], 0 }
   0x2   :  { %17 = vsyncpa [#allocation5], 0 }
   0x3   :  { %19 = vsyncpa [#allocation5 + $0x1], 0  ;;  %s1374_s27 = smov 0   ;;  %s1376_s28 = smov 0  }
   0x4   :  { %s1378_s29 = smov 0   ;;  %s1380_s30 = smov 0  }
   0x5 LB: > { %s1395_s9 = sadd.s32 4294967295, %s1326_s30   ;;  %s1116_s10 = sadd.s32 4294967294, %s1326_s30   ;;  %s1326_s30 = sphi %s1380_s30, %s1767_s30   ;;  %s1322_s29 = sphi %s1378_s29, %s1766_s29   ;;  %s1318_s28 = sphi %s1376_s28, %s1765_s28   ;;  %s1314_s27 = sphi %s1374_s27, %s1764_s27  }
   0x6   : > { %s1399_s11 = sadd.s32 1, %s1326_s30   ;;  %s194_s12 = sadd.s32 1, %s1322_s29 }
   0x7   : > { %s191_s13 = ssub.s32 %s1326_s30, %s1399_s11  ;;  %p204_p0 = scmp.ne.s32.totalorder %s1322_s29, %s1318_s28 }
   0x8   : > { %p192_p1 = scmp.eq.s32.totalorder %s191_s13, 0  ;;  %p205_p2 = scmp.eq.s32.totalorder %s1395_s9, 1 }
   0x9   : > { %p210_p3 = scmp.ne.s32.totalorder %s1318_s28, %s1314_s27  ;;  %p211_p4 = scmp.eq.s32.totalorder %s1116_s10, 1 }
   0xa   : > { %s1410_s14 = scalar_select %p192_p1, %s1322_s29, %s194_s12  }
   0xb   : > { %p1412_p5 = por %p205_p2, %p204_p0  ;;  %p1416_p6 = por %p211_p4, %p210_p3 }
   0xc   : > { %p1119_p7 = scmp.ge.s32.totalorder %s1326_s30, 1  ;;  %p290_p8 = scmp.lt.s32.totalorder %s1326_s30, 3 }
   0xe   : > { %p291_p9 = pnand %p1119_p7, %p290_p8 }
   0xf   : > { %p337_p10 = scmp.lt.s32.totalorder (!%p291_p9), %s1395_s9, 1  ;;  %s1702_s23 = sand.u32 (!%p291_p9), 1, %s1318_s28  }
  0x10   : > { %294 = sbr.rel (%p291_p9) target bundleno = 597 (0x255), region = 48  ;;  %s1168_s24 = sshll.u32 (!%p291_p9), %s1395_s9, 2 }
  0x11   : > { %s1120_s26 = sshll.u32 (!%p291_p9), %s1702_s23, 2 }
  0x12   : > { %s330_s12 = scalar_lea.vmem (!%p291_p9), [#allocation2], %s1120_s26  ;;  %s1252_s26 = scalar_lea.hbm (!%p291_p9), %s1760_s7, 8 }
  0x13   : > { %s989_s13 = sshll.u32 (!%p291_p9), %s330_s12, 4  ;;  %s990_s13 = int_to_ptr.vmem [resolvable:$true] %s989_s13 }
  0x15   : > { %s1424_s17 = scalar_select %p337_p10, %s1395_s9, 1  ;;  %vm628_vm0 = vcmask 203776   ;;  %v1328_v4 = vmov 0   ;;  %vm637_vm1 = vcmask 1040384   ;;  %vm662_vm2 = vcmask 1046528  }
  0x16   : > { %1224 = vset.pattern.permute.xlu1 %v1328_v4  ;;  %1225 = vset.pattern.permute.xlu2 %v1328_v4  ;;  %vm416_vm3 = vcmask 261120   ;;  %vm422_vm4 = vcmask 253952   ;;  %vm715_vm5 = vcmask 1043456   ;;  %vm711_vm6 = vcmask 64512  }
  0x17   : > { %s1172_s18 = sshll.u32 %s1424_s17, 4  ;;  %1226 = vset.pattern.permute.xlu0 %v1328_v4  ;;  %s1171_s22 = sshll.u32 %s1424_s17, 9  ;;  %vm765_vm7 = vcmask 1041409   ;;  %vm767_vm8 = vcmask 1042434   ;;  %vm769_vm9 = vcmask 1043459   ;;  %vm771_vm10 = vcmask 1044484  }
  0x18   : > { %s346_s21 = scalar_lea.vmem %s1754_s1, %s1172_s18  ;;  %s1446_s25 = scalar_lea.vmem %s1753_s0, %s1171_s22  ;;  %vm773_vm11 = vcmask 1045509   ;;  %vm775_vm12 = vcmask 1046534   ;;  %vm777_vm13 = vcmask 1047559   ;;  %vm944_vm14 = vcmask 130048  }
  0x19   : > { %v626_v0 = vld [vmem:[%s346_s21] sm:$0xff]  ;;  %v627_v2 = vld [vmem:[%s346_s21 + $0x8] sm:$0xff]  ;;  %v354_v24 = vld [vmem:[%s1446_s25 + $0x10] sm:$0xff]  ;;  %s1125_s19 = sshll.u32 %s1424_s17, 1  ;;  %s987_s17 = scalar_lea.hbm %s1760_s7, %s1168_s24  ;;  %vm961_vm15 = vcmask 60416  }
  0x1a   : > { %v629_v1 = vsel %vm628_vm0, %v626_v0, -inf  ;;  %v632_v3 = vsel %vm628_vm0, %v627_v2, -inf  ;;  %v352_v15 = vld [vmem:[%s1446_s25] sm:$0xff]  ;;  %v353_v16 = vld [vmem:[%s1446_s25 + $0x8] sm:$0xff]  ;;  %v358_v25 = vld [vmem:[%s1446_s25 + $0x30] sm:$0xff]  ;;  %v420_v31 = vsel %vm416_vm3, %v354_v24, -inf  ;;  %s350_s22 = scalar_lea.vmem %s1759_s6, %s1125_s19 }
  0x1b   : > { %630 = vmax.xlane.f32.xlu0 %v629_v1  ;;  %v356_v17 = vld [vmem:[%s1446_s25 + $0x20] sm:$0xff]  ;;  %v357_v18 = vld [vmem:[%s1446_s25 + $0x28] sm:$0xff]  ;;  %v417_v21 = vsel %vm416_vm3, %v352_v15, -inf  ;;  %v418_v22 = vsel %vm416_vm3, %v353_v16, -inf  ;;  %v362_v30 = vld [vmem:[%s1446_s25 + $0x50] sm:$0xff]  ;;  %v434_v33 = vsel %vm416_vm3, %v358_v25, -inf }
  0x1c   : > { %v360_v19 = vld [vmem:[%s1446_s25 + $0x40] sm:$0xff]  ;;  %v361_v20 = vld [vmem:[%s1446_s25 + $0x48] sm:$0xff]  ;;  %v431_v23 = vsel %vm416_vm3, %v356_v17, -inf  ;;  %v419_v26 = vmax.f32 %v417_v21, %v418_v22  ;;  %v432_v27 = vsel %vm416_vm3, %v357_v18, -inf  ;;  %v355_v35 = vld [vmem:[%s1446_s25 + $0x18] sm:$0x1] }
  0x1d   : > { %v444_v28 = vsel %vm416_vm3, %v360_v19, -inf  ;;  %v445_v29 = vsel %vm416_vm3, %v361_v20, -inf  ;;  %v433_v32 = vmax.f32 %v431_v23, %v432_v27  ;;  %v359_v36 = vld [vmem:[%s1446_s25 + $0x38] sm:$0x1]  ;;  %v364_v37 = vld [vmem:[%s1446_s25 + $0x60] sm:$0xff]  ;;  %v365_v40 = vld [vmem:[%s1446_s25 + $0x68] sm:$0xff] }
  0x1e   : > { %v446_v34 = vmax.f32 %v444_v28, %v445_v29  ;;  %v421_v38 = vmax.f32 %v419_v26, %v420_v31  ;;  %v363_v39 = vld [vmem:[%s1446_s25 + $0x58] sm:$0x1]  ;;  %v423_v41 = vsel %vm422_vm4, %v355_v35, -inf  ;;  %v366_v43 = vld [vmem:[%s1446_s25 + $0x70] sm:$0xff]  ;;  %v436_v45 = vsel %vm422_vm4, %v359_v36, -inf  ;;  %v368_v48 = vld [vmem:[%s1446_s25 + $0x80] sm:$0xff] }
  0x1f   : > { %v435_v42 = vmax.f32 %v433_v32, %v434_v33  ;;  %v447_v46 = vsel %vm416_vm3, %v362_v30, -inf  ;;  %v367_v47 = vld [vmem:[%s1446_s25 + $0x78] sm:$0x1]  ;;  %v449_v51 = vsel %vm422_vm4, %v363_v39, -inf  ;;  %v457_v52 = vsel %vm416_vm3, %v364_v37, -inf  ;;  %v369_v53 = vld [vmem:[%s1446_s25 + $0x88] sm:$0xff] }
  0x20   : > { %v424_v44 = vmax.f32 %v421_v38, %v423_v41  ;;  %v448_v50 = vmax.f32 %v446_v34, %v447_v46  ;;  %v458_v55 = vsel %vm416_vm3, %v365_v40, -inf  ;;  %v370_v56 = vld [vmem:[%s1446_s25 + $0x90] sm:$0xff]  ;;  %v460_v60 = vsel %vm416_vm3, %v366_v43, -inf  ;;  %v371_v61 = vld [vmem:[%s1446_s25 + $0x98] sm:$0x1]  ;;  %v372_v1 = vld [vmem:[%s1446_s25 + $0xa0] sm:$0xff] }
  0x21   : > { %v437_v49 = vmax.f32 %v435_v42, %v436_v45  ;;  %v459_v59 = vmax.f32 %v457_v52, %v458_v55  ;;  %v462_v63 = vsel %vm422_vm4, %v367_v47, -inf  ;;  %v470_v0 = vsel %vm416_vm3, %v368_v48, -inf  ;;  %v373_v2 = vld [vmem:[%s1446_s25 + $0xa8] sm:$0xff]  ;;  %v1227_v17 = vld [vmem:[%s1755_s2 + $0x1] ss:$0 sm:$0xff]  ;;  %v378_v32 = vld [vmem:[%s1446_s25 + $0xd0] sm:$0xff] }
  0x22   : > { %v425_v54 = vrot.slane %v424_v44, 4  ;;  %v450_v58 = vmax.f32 %v448_v50, %v449_v51  ;;  %v475_v16 = vsel %vm422_vm4, %v371_v61, -inf  ;;  %v483_v20 = vsel %vm416_vm3, %v372_v1, -inf  ;;  %v375_v22 = vld [vmem:[%s1446_s25 + $0xb8] sm:$0x1]  ;;  %v376_v23 = vld [vmem:[%s1446_s25 + $0xc0] sm:$0xff] }
  0x23   : > { %633 = vmax.xlane.f32.xlu0 %v632_v3  ;;  %v438_v57 = vrot.slane %v437_v49, 4  ;;  %v484_v21 = vsel %vm416_vm3, %v373_v2, -inf  ;;  %v377_v31 = vld [vmem:[%s1446_s25 + $0xc8] sm:$0xff]  ;;  %v488_v38 = vsel %vm422_vm4, %v375_v22, -inf  ;;  %v496_v39 = vsel %vm416_vm3, %v376_v23, -inf  ;;  %v380_v42 = vld [vmem:[%s1446_s25 + $0xe0] sm:$0xff] }
  0x24   : > { %v426_v62 = vmax.f32 %v424_v44, %v425_v54  ;;  %v451_v4 = vrot.slane %v450_v58, 4  ;;  %v485_v27 = vmax.f32 %v483_v20, %v484_v21  ;;  %v379_v41 = vld [vmem:[%s1446_s25 + $0xd8] sm:$0x1]  ;;  %v381_v43 = vld [vmem:[%s1446_s25 + $0xe8] sm:$0xff]  ;;  %v497_v48 = vsel %vm416_vm3, %v377_v31, -inf  ;;  %v382_v50 = vld [vmem:[%s1446_s25 + $0xf0] sm:$0xff] }
  0x25   : > { %v439_v3 = vmax.f32 %v437_v49, %v438_v57  ;;  %v499_v49 = vsel %vm416_vm3, %v378_v32, -inf  ;;  %v383_v51 = vld [vmem:[%s1446_s25 + $0xf8] sm:$0x1]  ;;  %v498_v54 = vmax.f32 %v496_v39, %v497_v48  ;;  %v384_v55 = vld [vmem:[%s1446_s25 + $0x100] sm:$0xff]  ;;  %v501_v57 = vsel %vm422_vm4, %v379_v41, -inf  ;;  %v386_v61 = vld [vmem:[%s1446_s25 + $0x110] sm:$0xff] }
  0x26   : > { %v1174_v2 = vld [vmem:[%s1756_s3 + $0x8] sm:$0xff]  ;;  %v1175_v21 = vld [vmem:[%s1756_s3 + $0x10] sm:$0xff]  ;;  %s991_s18 = sshll.u32 %s987_s17, 4  ;;  %s973_s19 = scalar_lea.sflag [#allocation3], %s1702_s23  ;;  %s992_s18 = int_to_ptr.hbm [resolvable:$true] %s991_s18 }
  0x27   : > { %808 = vmatpush.bf16.msra.mxu1 %v1174_v2  ;;  %s1246_s20 = sshra.s32 %s992_s18, 4  ;;  %s1247_s20 = int_to_ptr.hbm [resolvable:$true] %s1246_s20 }
  0x28   : > { %s1248_s21 = scalar_lea.hbm %s1247_s20, 4  ;;  %p1253_p0 = scmp.lt.s32.totalorder %s1247_s20, %s1760_s7 }
  0x29   : > { %p1249_p11 = scmp.ne.s32.totalorder %s1247_s20, %s1248_s21  ;;  %p1254_p1 = scmp.lt.s32.totalorder %s1252_s26, %s1248_s21 }
  0x2b   : > { %p1250_p12 = pnand %p1249_p11, %p1412_p5  ;;  %p1255_p2 = por %p1254_p1, %p1253_p0 }
  0x2d   : > { %p1251_p13 = pneg %p1250_p12 }
  0x2f   : > { %p1256_p3 = pnand %p1255_p2, %p1251_p13 }
  0x8e   : > { %v1430_v5 = vpop.xlane.xlu0 %630 }
  0x8f   : > { %v638_v6 = vrot.slane %v1430_v5, 7  ;;  %v663_v9 = vrot.slane %v1430_v5, 1  ;;  %v1502_v36 = vmul.f32 %v1227_v17, %v1430_v5 }
  0x91   : > { %v642_v7 = vsel %vm637_vm1, 0.0, %v638_v6 }
  0x92   : > { %646 = vperm.xlu1 %1224, %v642_v7   ;;  %v471_v7 = vsel %vm416_vm3, %v369_v53, -inf }
  0x96   : > { %v1434_v8 = vpop.xlane.xlu0 %633 }
  0x97   : > { %v639_v10 = vrot.slane %v1434_v8, 7  ;;  %v664_v11 = vrot.slane %v1434_v8, 1  ;;  %v1507_v40 = vmul.f32 %v1227_v17, %v1434_v8  ;;  %v522_v17 = vsel %vm416_vm3, %v384_v55, -inf }
  0x99   : > { %v665_v12 = vsel %vm662_vm2, %v663_v9, %v664_v11  ;;  %v640_v13 = vsel %vm637_vm1, %v638_v6, %v639_v10  ;;  %v667_v14 = vsel %vm662_vm2, %v664_v11, 0.0  ;;  %v461_v6 = vmax.f32 %v459_v59, %v460_v60  ;;  %v385_v60 = vld [vmem:[%s1446_s25 + $0x108] sm:$0xff] }
  0x9a   : > { %670 = vperm.xlu2 %1225, %v665_v12   ;;  %650 = vperm.xlu1 %1224, %v640_v13   ;;  %v427_v9 = vrot.slane %v426_v62, 2  ;;  %v472_v10 = vmax.f32 %v470_v0, %v471_v7  ;;  %v473_v11 = vsel %vm416_vm3, %v370_v56, -inf  ;;  %v374_v12 = vld [vmem:[%s1446_s25 + $0xb0] sm:$0xff]  ;;  %v440_v13 = vrot.slane %v439_v3, 2 }
  0x9b   : > { %v463_v15 = vmax.f32 %v461_v6, %v462_v63  ;;  %v486_v30 = vsel %vm416_vm3, %v374_v12, -inf  ;;  %v510_v59 = vsel %vm416_vm3, %v381_v43, -inf  ;;  %v500_v0 = vmax.f32 %v498_v54, %v499_v49  ;;  %v388_v6 = vld [vmem:[%s1446_s25 + $0x120] sm:$0xff]  ;;  %v393_v43 = vld [vmem:[%s1446_s25 + $0x148] sm:$0xff]  ;;  %v394_v49 = vld [vmem:[%s1446_s25 + $0x150] sm:$0xff] }
  0x9c   : > { %v428_v18 = vmax.f32 %v426_v62, %v427_v9  ;;  %v474_v19 = vmax.f32 %v472_v10, %v473_v11  ;;  %v441_v24 = vmax.f32 %v439_v3, %v440_v13  ;;  %v487_v35 = vmax.f32 %v485_v27, %v486_v30  ;;  %v1176_v3 = vld [vmem:[%s1756_s3 + $0x18] sm:$0xff]  ;;  %v1539_v12 = vld [vmem:[%s1755_s2 + $0x2] ss:$0 sm:$0xff] }
  0x9d   : > { %v464_v26 = vrot.slane %v463_v15, 4  ;;  %v512_v10 = vsel %vm416_vm3, %v382_v50, -inf  ;;  %v514_v11 = vsel %vm422_vm4, %v383_v51, -inf  ;;  %v710_v13 = vld [vmem:[%s1757_s4] sm:$0xf]  ;;  %858 = vmatpush.bf16.msra.mxu3 %v1176_v3  ;;  %v551_v3 = vsel %vm416_vm3, %v394_v49, -inf }
  0x9e   : > { %v429_v28 = vrot.slane %v428_v18, 1  ;;  %v476_v29 = vmax.f32 %v474_v19, %v475_v16  ;;  %v442_v33 = vrot.slane %v441_v24, 1  ;;  %v489_v46 = vmax.f32 %v487_v35, %v488_v38  ;;  %v1173_v19 = vld [vmem:[%s1756_s3] sm:$0xff]  ;;  %v391_v35 = vld [vmem:[%s1446_s25 + $0x138] sm:$0x1] }
  0x9f   : > { %v465_v34 = vmax.f32 %v463_v15, %v464_v26  ;;  %v502_v15 = vmax.f32 %v500_v0, %v501_v57  ;;  %809 = vmatpush.bf16.msra.mxu1 %v1173_v19  ;;  %v395_v50 = vld [vmem:[%s1446_s25 + $0x158] sm:$0x1]  ;;  %v396_v54 = vld [vmem:[%s1446_s25 + $0x160] sm:$0xff]  ;;  %v540_v57 = vsel %vm422_vm4, %v391_v35, -inf  ;;  %v398_v0 = vld [vmem:[%s1446_s25 + $0x170] sm:$0xff] }
  0xa0   : > { %v477_v37 = vrot.slane %v476_v29, 4  ;;  %v1512_v47 = vmax.f32 %v428_v18, %v429_v28  ;;  %v1518_v8 = vmax.f32 %v441_v24, %v442_v33  ;;  %v490_v53 = vrot.slane %v489_v46, 4  ;;  %v389_v24 = vld [vmem:[%s1446_s25 + $0x128] sm:$0xff] }
  0xa1   : > { %v466_v45 = vrot.slane %v465_v34, 2  ;;  %v717_v18 = vsel %vm715_vm5, %v710_v13, 0  ;;  %v503_v26 = vrot.slane %v502_v15, 4  ;;  %v523_v28 = vsel %vm416_vm3, %v385_v60, -inf  ;;  %859 = vmatpush.bf16.msra.mxu3 %v1175_v21  ;;  %v399_v13 = vld [vmem:[%s1446_s25 + $0x178] sm:$0x1] }
  0xa2   : > { %675 = vperm.xlu2 %1225, %v667_v14   ;;  %v452_v14 = vmax.f32 %v450_v58, %v451_v4  ;;  %v478_v5 = vmax.f32 %v476_v29, %v477_v37  ;;  %v509_v58 = vsel %vm416_vm3, %v380_v42, -inf  ;;  %v491_v63 = vmax.f32 %v489_v46, %v490_v53  ;;  %v387_v4 = vld [vmem:[%s1446_s25 + $0x118] sm:$0x1]  ;;  %726 = vmatpush.bf16.msra.mxu0 %v717_v18  ;;  %v392_v37 = vld [vmem:[%s1446_s25 + $0x140] sm:$0xff] }
  0xa3   : > { %v467_v52 = vmax.f32 %v465_v34, %v466_v45  ;;  %v511_v1 = vmax.f32 %v509_v58, %v510_v59  ;;  %v525_v29 = vsel %vm416_vm3, %v386_v61, -inf  ;;  %v524_v34 = vmax.f32 %v522_v17, %v523_v28  ;;  %v397_v59 = vld [vmem:[%s1446_s25 + $0x168] sm:$0xff] }
  0xa4   : > { %v453_v25 = vrot.slane %v452_v14, 2  ;;  %v479_v56 = vrot.slane %v478_v5, 2  ;;  %v492_v23 = vrot.slane %v491_v63, 2  ;;  %v504_v38 = vmax.f32 %v502_v15, %v503_v26  ;;  %v401_v15 = vld [vmem:[%s1446_s25 + $0x188] sm:$0xff] }
  0xa5   : > { %v468_v7 = vrot.slane %v467_v52, 1  ;;  %v513_v16 = vmax.f32 %v511_v1, %v512_v10  ;;  %v527_v41 = vsel %vm422_vm4, %v387_v4, -inf  ;;  %v535_v42 = vsel %vm416_vm3, %v388_v6, -inf }
  0xa6   : > { %v454_v44 = vmax.f32 %v452_v14, %v453_v25  ;;  %v480_v9 = vmax.f32 %v478_v5, %v479_v56  ;;  %v1140_v14 = vld [vmem:[%s1757_s4 + $0x4] sm:$0xf]  ;;  %v390_v25 = vld [vmem:[%s1446_s25 + $0x130] sm:$0xff]  ;;  %v493_v33 = vmax.f32 %v491_v63, %v492_v23  ;;  %v526_v45 = vmax.f32 %v524_v34, %v525_v29 }
  0xa7   : > { %v824_v20 = vsel %vm715_vm5, %v1140_v14, 0  ;;  %v515_v27 = vmax.f32 %v513_v16, %v514_v11  ;;  %v1562_v32 = vmax.f32 %v467_v52, %v468_v7  ;;  %v536_v46 = vsel %vm416_vm3, %v389_v24, -inf  ;;  %v400_v14 = vld [vmem:[%s1446_s25 + $0x180] sm:$0xff]  ;;  %v402_v24 = vld [vmem:[%s1446_s25 + $0x190] sm:$0xff] }
  0xa8   : > { %v455_v62 = vrot.slane %v454_v44, 1  ;;  %v481_v22 = vrot.slane %v480_v9, 1  ;;  %833 = vmatpush.bf16.msra.mxu2 %v824_v20  ;;  %v538_v5 = vsel %vm416_vm3, %v390_v25, -inf  ;;  %v505_v51 = vrot.slane %v504_v38, 2  ;;  %v403_v25 = vld [vmem:[%s1446_s25 + $0x198] sm:$0x1] }
  0xa9   : > { %v516_v39 = vrot.slane %v515_v27, 4  ;;  %v537_v53 = vmax.f32 %v535_v42, %v536_v46  ;;  %v494_v55 = vrot.slane %v493_v33, 1  ;;  %v528_v56 = vmax.f32 %v526_v45, %v527_v41  ;;  %v407_v46 = vld [vmem:[%s1446_s25 + $0x1b8] sm:$0x1] }
  0xaa   : > { %v1560_v31 = vmax.f32 %v454_v44, %v455_v62  ;;  %v1569_v44 = vmax.f32 %v480_v9, %v481_v22  ;;  %v548_v58 = vsel %vm416_vm3, %v392_v37, -inf  ;;  %v506_v60 = vmax.f32 %v504_v38, %v505_v51  ;;  %v1608_v37 = vld [vmem:[%s1755_s2] ss:$0 sm:$0xff]  ;;  %v405_v38 = vld [vmem:[%s1446_s25 + $0x1a8] sm:$0xff] }
  0xab   : > { %v517_v52 = vmax.f32 %v515_v27, %v516_v39  ;;  %v539_v62 = vmax.f32 %v537_v53, %v538_v5  ;;  %v549_v63 = vsel %vm416_vm3, %v393_v43, -inf  ;;  %v529_v1 = vrot.slane %v528_v56, 4  ;;  %v406_v39 = vld [vmem:[%s1446_s25 + $0x1b0] sm:$0xff] }
  0xac   : > { %v550_v2 = vmax.f32 %v548_v58, %v549_v63  ;;  %v553_v4 = vsel %vm422_vm4, %v395_v50, -inf  ;;  %v507_v6 = vrot.slane %v506_v60, 1  ;;  %v561_v10 = vsel %vm416_vm3, %v396_v54, -inf }
  0xad   : > { %v518_v61 = vrot.slane %v517_v52, 2  ;;  %v541_v9 = vmax.f32 %v539_v62, %v540_v57  ;;  %v1590_v16 = vmax.f32 %v493_v33, %v494_v55  ;;  %v530_v17 = vmax.f32 %v528_v56, %v529_v1  ;;  %v409_v57 = vld [vmem:[%s1446_s25 + $0x1c8] sm:$0xff] }
  0xae   : > { %v552_v18 = vmax.f32 %v550_v2, %v551_v3  ;;  %v562_v19 = vsel %vm416_vm3, %v397_v59, -inf  ;;  %v564_v23 = vsel %vm416_vm3, %v398_v0, -inf  ;;  %v1599_v26 = vmax.f32 %v506_v60, %v507_v6 }
  0xaf   : > { %v519_v7 = vmax.f32 %v517_v52, %v518_v61  ;;  %v542_v22 = vrot.slane %v541_v9, 4  ;;  %v531_v27 = vrot.slane %v530_v17, 2  ;;  %v563_v29 = vmax.f32 %v561_v10, %v562_v19  ;;  %v408_v52 = vld [vmem:[%s1446_s25 + $0x1c0] sm:$0xff]  ;;  %v411_v10 = vld [vmem:[%s1446_s25 + $0x1d8] sm:$0x1] }
  0xb0   : > { %v554_v28 = vmax.f32 %v552_v18, %v553_v4  ;;  %v574_v34 = vsel %vm416_vm3, %v400_v14, -inf  ;;  %v575_v35 = vsel %vm416_vm3, %v401_v15, -inf  ;;  %v577_v50 = vsel %vm416_vm3, %v402_v24, -inf  ;;  %v410_v4 = vld [vmem:[%s1446_s25 + $0x1d0] sm:$0xff]  ;;  %v1230_v18 = vld [vmem:[%s1758_s5] ss:$0 sm:$0xff] }
  0xb1   : > { %v520_v21 = vrot.slane %v519_v7, 1  ;;  %v543_v33 = vmax.f32 %v541_v9, %v542_v22  ;;  %v532_v41 = vmax.f32 %v530_v17, %v531_v27  ;;  %v565_v43 = vmax.f32 %v563_v29, %v564_v23  ;;  %v412_v19 = vld [vmem:[%s1446_s25 + $0x1e0] sm:$0xff]  ;;  %v1178_v24 = vld [vmem:[%s1756_s3 + $0x28] sm:$0xff] }
  0xb2   : > { %v555_v42 = vrot.slane %v554_v28, 4  ;;  %v576_v45 = vmax.f32 %v574_v34, %v575_v35  ;;  %v579_v51 = vsel %vm422_vm4, %v403_v25, -inf  ;;  %v588_v60 = vsel %vm416_vm3, %v405_v38, -inf  ;;  %v413_v25 = vld [vmem:[%s1446_s25 + $0x1e8] sm:$0xff]  ;;  %908 = vmatpush.bf16.msrb.mxu2 %v1178_v24  ;;  %v1177_v38 = vld [vmem:[%s1756_s3 + $0x20] sm:$0xff] }
  0xb3   : > { %v1613_v5 = vmax.f32 %v519_v7, %v520_v21  ;;  %v544_v49 = vrot.slane %v543_v33, 2  ;;  %v533_v58 = vrot.slane %v532_v41, 1  ;;  %v590_v61 = vsel %vm416_vm3, %v406_v39, -inf }
  0xb4   : > { %v556_v53 = vmax.f32 %v554_v28, %v555_v42  ;;  %v578_v55 = vmax.f32 %v576_v45, %v577_v50  ;;  %v592_v2 = vsel %vm422_vm4, %v407_v46, -inf  ;;  %v600_v9 = vsel %vm416_vm3, %v408_v52, -inf  ;;  %v415_v46 = vld [vmem:[%s1446_s25 + $0x1f8] sm:$0x1] }
  0xb5   : > { %v545_v59 = vmax.f32 %v543_v33, %v544_v49  ;;  %v601_v15 = vsel %vm416_vm3, %v409_v57, -inf  ;;  %v1633_v21 = vmax.f32 %v532_v41, %v533_v58  ;;  %v414_v33 = vld [vmem:[%s1446_s25 + $0x1f0] sm:$0xff]  ;;  %v605_v35 = vsel %vm422_vm4, %v411_v10, -inf }
  0xb6   : > { %v557_v63 = vrot.slane %v556_v53, 2  ;;  %v580_v1 = vmax.f32 %v578_v55, %v579_v51  ;;  %v602_v23 = vmax.f32 %v600_v9, %v601_v15  ;;  %v614_v50 = vsel %vm416_vm3, %v413_v25, -inf  ;;  %909 = vmatpush.bf16.msrb.mxu2 %v1177_v38 }
  0xb7   : > { %v546_v6 = vrot.slane %v545_v59, 1  ;;  %v616_v55 = vsel %vm416_vm3, %v414_v33, -inf  ;;  %v693_v15 = vpack.c.bf16 %v1569_v44, %v1569_v44 }
  0xb8   : > { %v581_v14 = vrot.slane %v580_v1, 4 }
  0xb9   : > { %v1646_v39 = vmax.f32 %v545_v59, %v546_v6 }
  0xba   : > { %v582_v29 = vmax.f32 %v580_v1, %v581_v14 }
  0xbc   : > { %v583_v42 = vrot.slane %v582_v29, 2 }
  0xf4   : > { %v671_v30 = vpop.permute.xlu2 %670 }
  0xf5   : > { %v1574_v48 = vmul.f32 %v1539_v12, %v671_v30  ;;  %v404_v30 = vld [vmem:[%s1446_s25 + $0x1a0] sm:$0xff] }
  0xf6   : > { %v587_v56 = vsel %vm416_vm3, %v404_v30, -inf }
  0xf7   : > { %v589_v7 = vmax.f32 %v587_v56, %v588_v60 }
  0xf9   : > { %v591_v22 = vmax.f32 %v589_v7, %v590_v61  ;;  %v690_v7 = vpack.c.bf16 %v1518_v8, %v1518_v8 }
  0xfb   : > { %v750_v33 = vunpack.c.l.b16 %v690_v7 }
  0xfc   : > { %v676_v11 = vpop.permute.xlu2 %675 }
  0xfd   : > { %v1594_v20 = vmul.f32 %v1539_v12, %v676_v11  ;;  %v566_v12 = vsel %vm422_vm4, %v399_v13, -inf  ;;  %v558_v11 = vmax.f32 %v556_v53, %v557_v63  ;;  %v584_v53 = vmax.f32 %v582_v29, %v583_v42 }
  0xfe   : > { %v567_v54 = vmax.f32 %v565_v43, %v566_v12  ;;  %v593_v12 = vmax.f32 %v591_v22, %v592_v2  ;;  %v613_v43 = vsel %vm416_vm3, %v412_v19, -inf  ;;  %v618_v63 = vsel %vm422_vm4, %v415_v46, -inf }
  0xff   : > { %v559_v27 = vrot.slane %v558_v11, 1  ;;  %v585_v61 = vrot.slane %v584_v53, 1 }
 0x100   : > { %v568_v0 = vrot.slane %v567_v54, 4  ;;  %v594_v49 = vrot.slane %v593_v12, 4 }
 0x101   : > { %v560_v57 = vmax.f32 %v558_v11, %v559_v27 }
 0x102   : > { %v569_v13 = vmax.f32 %v567_v54, %v568_v0  ;;  %v615_v54 = vmax.f32 %v613_v43, %v614_v50  ;;  %v595_v58 = vmax.f32 %v593_v12, %v594_v49 }
 0x104   : > { %v647_v62 = vpop.permute.xlu1 %646  ;;  %v570_v28 = vrot.slane %v569_v13, 2  ;;  %v596_v2 = vrot.slane %v595_v58, 2 }
 0x105   : > { %v654_v3 = vmul.f32 %v1608_v37, %v647_v62  ;;  %v617_v62 = vmax.f32 %v615_v54, %v616_v55 }
 0x106   : > { %v571_v41 = vmax.f32 %v569_v13, %v570_v28  ;;  %v597_v10 = vmax.f32 %v595_v58, %v596_v2  ;;  %v691_v13 = vpack.c.bf16 %v1560_v31, %v1560_v31  ;;  %v696_v31 = vpack.c.bf16 %v1613_v5, %v1613_v5 }
 0x107   : > { %v660_v17 = vadd.f32 %v1502_v36, %v654_v3  ;;  %v603_v36 = vsel %vm416_vm3, %v410_v4, -inf  ;;  %v586_v4 = vmax.f32 %v584_v53, %v585_v61  ;;  %v619_v6 = vmax.f32 %v617_v62, %v618_v63  ;;  %v1155_v53 = vld [vmem:[%s1757_s4 + $0x8] sm:$0xf] }
 0x108   : > { %v604_v34 = vmax.f32 %v602_v23, %v603_v36  ;;  %v572_v52 = vrot.slane %v571_v41, 1  ;;  %v598_v19 = vrot.slane %v597_v10, 1  ;;  %v697_v23 = vpack.c.bf16 %v1633_v21, %v1633_v21 }
 0x109   : > { %v681_v30 = vadd.f32 %v1574_v48, %v660_v17  ;;  %v620_v14 = vrot.slane %v619_v6, 4  ;;  %v701_v28 = vpack.c.bf16 %v586_v4, %v586_v4  ;;  %v751_v5 = vunpack.c.l.b16 %v691_v13 }
 0x10a   : > { %v606_v48 = vmax.f32 %v604_v34, %v605_v35  ;;  %v573_v1 = vmax.f32 %v571_v41, %v572_v52  ;;  %v599_v24 = vmax.f32 %v597_v10, %v598_v19  ;;  %v753_v35 = vunpack.c.l.b16 %v693_v15 }
 0x10b   : > { %v685_v45 = vadd.f32 %v1230_v18, %v681_v30  ;;  %v621_v22 = vmax.f32 %v619_v6, %v620_v14  ;;  %v756_v41 = vunpack.c.l.b16 %v696_v31  ;;  %v757_v43 = vunpack.c.l.b16 %v697_v23 }
 0x10c   : > { %v651_v51 = vpop.permute.xlu1 %650  ;;  %v607_v59 = vrot.slane %v606_v48, 4  ;;  %v700_v27 = vpack.c.bf16 %v573_v1, %v573_v1  ;;  %v702_v30 = vpack.c.bf16 %v599_v24, %v599_v24  ;;  %v874_v61 = vsel %vm715_vm5, %v1155_v53, 0 }
 0x10d   : > { %v655_v56 = vmul.f32 %v1608_v37, %v651_v51  ;;  %v687_v60 = vmax.f32 %v685_v45, 0.0  ;;  %v689_v37 = vpack.c.bf16 %v1512_v47, %v1512_v47  ;;  %v694_v47 = vpack.c.bf16 %v1590_v16, %v1590_v16  ;;  %883 = vmatpush.bf16.msrb.mxu0 %v874_v61 }
 0x10e   : > { %v608_v3 = vmax.f32 %v606_v48, %v607_v59  ;;  %v699_v16 = vpack.c.bf16 %v560_v57, %v560_v57  ;;  %v760_v49 = vunpack.c.l.b16 %v700_v27  ;;  %v761_v48 = vunpack.c.l.b16 %v701_v28 }
 0x10f   : > { %v661_v0 = vadd.f32 %v1507_v40, %v655_v56  ;;  %v692_v40 = vpack.c.bf16 %v1562_v32, %v1562_v32  ;;  %v698_v32 = vpack.c.bf16 %v1646_v39, %v1646_v39  ;;  %v749_v29 = vunpack.c.l.b16 %v689_v37 }
 0x110   : > { %v609_v11 = vrot.slane %v608_v3, 2  ;;  %v754_v38 = vunpack.c.l.b16 %v694_v47  ;;  %v759_v46 = vunpack.c.l.b16 %v699_v16  ;;  %v762_v50 = vunpack.c.l.b16 %v702_v30  ;;  %v1231_v30 = vld [vmem:[%s1758_s5 + $0x1] ss:$0 sm:$0xff] }
 0x111   : > { %v682_v9 = vadd.f32 %v1594_v20, %v661_v0  ;;  %v695_v20 = vpack.c.bf16 %v1599_v26, %v1599_v26  ;;  %v752_v34 = vunpack.c.l.b16 %v692_v40  ;;  %v758_v45 = vunpack.c.l.b16 %v698_v32 }
 0x112   : > { %v610_v8 = vmax.f32 %v608_v3, %v609_v11  ;;  %v766_v52 = vsel %vm765_vm7, %v750_v33, %v749_v29 }
 0x113   : > { %v686_v17 = vadd.f32 %v1230_v18, %v682_v9  ;;  %v622_v18 = vrot.slane %v621_v22, 2  ;;  %v755_v39 = vunpack.c.l.b16 %v695_v20  ;;  %v768_v55 = vsel %vm767_vm8, %v751_v5, %v766_v52 }
 0x114   : > { %v611_v25 = vrot.slane %v610_v8, 1  ;;  %v770_v57 = vsel %vm769_vm9, %v752_v34, %v768_v55  ;;  %v779_v58 = vsel %vm765_vm7, %v758_v45, %v757_v43 }
 0x115   : > { %v688_v44 = vmax.f32 %v686_v17, 0.0  ;;  %v623_v12 = vmax.f32 %v621_v22, %v622_v18  ;;  %v772_v59 = vsel %vm771_vm10, %v753_v35, %v770_v57 }
 0x116   : > { %v612_v26 = vmax.f32 %v610_v8, %v611_v25  ;;  %v774_v63 = vsel %vm773_vm11, %v754_v38, %v772_v59 }
 0x117   : > { %v705_v36 = vpack.c.bf16 %v688_v44, %v687_v60  ;;  %v624_v42 = vrot.slane %v623_v12, 1  ;;  %v780_v60 = vsel %vm767_vm8, %v759_v46, %v779_v58  ;;  %v776_v1 = vsel %vm775_vm12, %v755_v39, %v774_v63 }
 0x118   : > { %v703_v21 = vpack.c.bf16 %v612_v26, %v612_v26  ;;  %v781_v0 = vsel %vm769_vm9, %v760_v49, %v780_v60  ;;  %v778_v3 = vsel %vm777_vm13, %v756_v41, %v776_v1 }
 0x119   : > { %1126 = vmatmul.msk.bf16.vlgmr.msra.gmra.mxu0 %vm711_vm6, %v705_v36  ;;  %1141 = vmatmul.msk.bf16.vlgmr.msra.gmra.mxu2 %vm711_vm6, %v705_v36  ;;  %v625_v51 = vmax.f32 %v623_v12, %v624_v42  ;;  %v782_v2 = vsel %vm771_vm10, %v761_v48, %v781_v0  ;;  %v942_v42 = vld [vmem:[%s350_s22] sm:$0x3] }
 0x11a   : > { %v763_v54 = vunpack.c.l.b16 %v703_v21  ;;  %v783_v4 = vsel %vm773_vm11, %v762_v50, %v782_v2 }
 0x11b   : > { %v704_v56 = vpack.c.bf16 %v625_v51, %v625_v51 }
 0x11c   : > { %v784_v6 = vsel %vm775_vm12, %v763_v54, %v783_v4 }
 0x11d   : > { %v764_v62 = vunpack.c.l.b16 %v704_v56 }
 0x11f   : > { %v785_v37 = vsel %vm777_vm13, %v764_v62, %v784_v6 }
 0x120   : > { %v786_v7 = vpack.c.b16 %v785_v37, %v778_v3 }
 0x122   : > { %1135 = vmatmul.msk.bf16.vlgmr.msra.gmra.mxu1 %vm416_vm3, %v786_v7  ;;  %1150 = vmatmul.msk.bf16.vlgmr.msra.gmra.mxu3 %vm416_vm3, %v786_v7 }
 0x129   : > { %1156 = vmatmul.msk.bf16.vlgmr.msrb.gmra.mxu0 %vm711_vm6, %v705_v36  ;;  %1165 = vmatmul.msk.bf16.vlgmr.msrb.gmra.mxu2 %vm416_vm3, %v786_v7 }
 0x196   : > { %v728_v9 = vpop.f32.mrf.mxu0 }
 0x19c   : > { %v835_v10 = vpop.f32.mrf.mxu2 }
 0x19e   : > { %v730_v11 = vpop.f32.mrf.mxu0 }
 0x19f   : > { %v811_v13 = vpop.f32.mrf.mxu1 }
 0x1a0   : > { %v812_v19 = vadd.f32 %v811_v13, %v728_v9 }
 0x1a2   : > { %v918_v22 = vrot.slane %v812_v19, 7 }
 0x1a4   : > { %v837_v14 = vpop.f32.mrf.mxu2  ;;  %v923_v18 = vsel %vm637_vm1, 0.0, %v918_v22 }
 0x1a5   : > { %v861_v40 = vpop.f32.mrf.mxu3 }
 0x1a6   : > { %v885_v15 = vpop.f32.mrf.mxu0  ;;  %v862_v32 = vadd.f32 %v861_v40, %v835_v10 }
 0x1a7   : > { %v813_v47 = vpop.f32.mrf.mxu1 }
 0x1a8   : > { %v814_v8 = vadd.f32 %v813_v47, %v730_v11  ;;  %v924_v36 = vadd.f32 %v923_v18, %v862_v32 }
 0x1aa   : > { %v919_v31 = vrot.slane %v814_v8, 7 }
 0x1ac   : > { %v911_v17 = vpop.f32.mrf.mxu2  ;;  %v920_v27 = vsel %vm637_vm1, %v918_v22, %v919_v31 }
 0x1ad   : > { %v863_v20 = vpop.f32.mrf.mxu3  ;;  %v912_v23 = vadd.f32 %v911_v17, %v885_v15 }
 0x1ae   : > { %v864_v44 = vadd.f32 %v863_v20, %v837_v14  ;;  %v887_v24 = vpop.f32.mrf.mxu0 }
 0x1af   : > { %v928_v28 = vrot.slane %v912_v23, 1 }
 0x1b0   : > { %v925_v26 = vadd.f32 %v920_v27, %v864_v44 }
 0x1b4   : > { %v913_v25 = vpop.f32.mrf.mxu2 }
 0x1b5   : > { %v914_v16 = vadd.f32 %v913_v25, %v887_v24 }
 0x1b7   : > { %v929_v29 = vrot.slane %v914_v16, 1 }
 0x1b9   : > { %v930_v33 = vsel %vm662_vm2, %v928_v28, %v929_v29  ;;  %v933_v12 = vsel %vm662_vm2, %v929_v29, 0.0 }
 0x1ba   : > { %v935_v5 = vadd.f32 %v933_v12, %v925_v26  ;;  %v934_v34 = vadd.f32 %v930_v33, %v924_v36 }
 0x1bc   : > { %v938_v35 = vadd.f32 %v1231_v30, %v934_v34  ;;  %v939_v21 = vadd.f32 %v1231_v30, %v935_v5 }
 0x1be   : > { %v940_v38 = vmax.f32 %v938_v35, 0.0  ;;  %v941_v39 = vmax.f32 %v939_v21, 0.0 }
 0x1c0   : > { %v943_v41 = vpack.c.bf16 %v941_v39, %v940_v38 }
 0x1c2   : > { %955 = vmatpush.bf16.msrb.mxu1 %v943_v41 }
 0x1c5   : > { %1166 = vmatmul.msk.bf16.vlgmr.msrb.gmra.mxu1 %vm944_vm14, %v942_v42 }
 0x242   : > { %v957_v43 = vpop.f32.mrf.mxu1 }
 0x243   : > { %962 = vst.msk [vmem:[%s330_s12] sm:$0xf] %vm961_vm15, %v957_v43  ;;  %v963_v45 = vsel %vm961_vm15, %v957_v43, -inf }
 0x244   : > { %v964_v46 = vrot.slane %v963_v45, 4 }
 0x245   : > { %1259 = shalt.err (!%p1256_p3)
}
 0x246   : > { %1179 = dma.vmem_to_hbm [thread:$0]  (%p1412_p5), %s990_s13, 64, %s992_s18, %s973_s19   ;;  %v965_v49 = vmax.f32 %v963_v45, %v964_v46  ;;  %vm970_vm0 = vcmask 57344  }
 0x247   : > { %s1000_s22 = scalar_lea.hbm %s1761_s8, %s1395_s9  ;;  %s336_s20 = scalar_lea.vmem [#allocation4], %s1702_s23 }
 0x248   : > { %v966_v48 = vrot.slane %v965_v49, 2  ;;  %s1002_s21 = sshll.u32 %s336_s20, 4  ;;  %s1004_s24 = sshll.u32 %s1000_s22, 4  ;;  %s1003_s21 = int_to_ptr.vmem [resolvable:$true] %s1002_s21  ;;  %s1005_s24 = int_to_ptr.hbm [resolvable:$true] %s1004_s24 }
 0x249   : > { %s978_s26 = scalar_lea.sflag [#allocation5], %s1702_s23  ;;  %s1274_s13 = sshra.s32 %s1005_s24, 4  ;;  %s1275_s13 = int_to_ptr.hbm [resolvable:$true] %s1274_s13 }
 0x24a   : > { %v967_v50 = vmax.f32 %v965_v49, %v966_v48  ;;  %v959_v51 = vpop.f32.mrf.mxu1  ;;  %s1276_s18 = scalar_lea.hbm %s1275_s13, 1  ;;  %s1280_s10 = scalar_lea.hbm %s1761_s8, 2 }
 0x24b   : > { %p1277_p4 = scmp.ne.s32.totalorder %s1275_s13, %s1276_s18  ;;  %p1281_p9 = scmp.lt.s32.totalorder %s1275_s13, %s1761_s8 }
 0x24c   : > { %v968_v52 = vrot.slane %v967_v50, 1  ;;  %p1282_p10 = scmp.lt.s32.totalorder %s1280_s10, %s1276_s18 }
 0x24d   : > { %p1278_p7 = pnand %p1277_p4, %p1412_p5 }
 0x24e   : > { %v969_v53 = vmax.f32 %v967_v50, %v968_v52  ;;  %p1283_p11 = por %p1282_p10, %p1281_p9 }
 0x24f   : > { %p1279_p8 = pneg %p1278_p7 }
 0x250   : > { %971 = vst.msk [vmem:[%s336_s20] sm:$0x1] %vm970_vm0, %v969_v53 }
 0x251   : > { %p1284_p12 = pnand %p1283_p11, %p1279_p8 }
 0x253   : > { %1287 = shalt.err (!%p1284_p12)
}
 0x254   : > { %1180 = dma.vmem_to_hbm [thread:$0]  (%p1412_p5), %s1003_s21, 16, %s1005_s24, %s978_s26  }
 0x255 PF: > { %p1190_p13 = scmp.ge.s32.totalorder %s1326_s30, 2  ;;  %s1016_s23 = sand.u32 1, %s1314_s27  }
 0x256   : > { %s1017_s12 = scalar_lea.sflag [#allocation3], %s1016_s23 }
 0x257   : > { %p1184_p0 = pnand %p1190_p13, %p1416_p6 }
 0x259   : > { %p1185_p1 = pneg %p1184_p0 }
 0x25b   : > { %1305 = dma.done.wait (%p1185_p1), %s1017_s12, 64  }
 0x25c   : > { %1307 = vsyncadd (%p1185_p1), %s1017_s12, 4294967232  ;;  %s1027_s22 = scalar_lea.sflag [#allocation5], %s1016_s23 }
 0x25d   : > { %1309 = dma.done.wait (%p1185_p1), %s1027_s22, 16  }
 0x25e   : > { %1311 = vsyncadd (%p1185_p1), %s1027_s22, 4294967280  ;;  %p22_p5 = scmp.ge.s32.totalorder %s1399_s11, 4   ;;  %s1764_s27 = smov %s1318_s28 }
 0x25f   : > { %s1765_s28 = smov %s1322_s29  ;;  %s1766_s29 = smov %s1410_s14 }
 0x260   : > { %s1767_s30 = smov %s1399_s11  ;;  %24 = sbr.rel (!%p22_p5) target bundleno = 5 (0x5), region = 110 }
 0x265   :  { %1032 = vsyncpa [#allocation3], 1 }
 0x266   :  { %1034 = vsyncpa [#allocation3 + $0x1], 1 }
 0x267   :  { %1035 = vsyncpa [#allocation5], 1 }
 0x268   :  { %1037 = vsyncpa [#allocation5 + $0x1], 1 }

</bundles_post_ra>
